<compile_context>
chip_gen: v6e
topology: v6e:2x2x1
jax: 0.10.0
libtpu: 0.0.40
codegen_flags: <defaults>
</compile_context>

<pallas_src>
import functools

import jax
import jax.numpy as jnp
from jax.experimental import pallas as pl
from jax.experimental.pallas import tpu as pltpu


def _self_attention_kernel(x_ref, wqkv_ref, bqkv_ref, o_ref, *, dp):
    bt, s, din = x_ref.shape

    # ---- fused QKV projection: one (Bt*S, Din) @ (Din, 3*Dp) MXU matmul ----
    x2d = x_ref[...].reshape(bt * s, din)
    qkv = jnp.dot(x2d, wqkv_ref[...], preferred_element_type=jnp.float32)
    qkv = qkv + bqkv_ref[...]                      # single hoisted bias add
    qkv = qkv.reshape(bt, s, 3 * dp)

    q = qkv[:, :, 0 * dp:1 * dp]                   # (Bt, S, Dp), 128-aligned slices
    k = qkv[:, :, 1 * dp:2 * dp]
    v = qkv[:, :, 2 * dp:3 * dp]

    # ---- attn = einsum('ijk,ilk->ijl', q, k): contraction on last dims -----
    # (no explicit transpose; matches the reference — intentionally NO 1/sqrt(d))
    scores = jnp.einsum('bqd,bkd->bqk', q, k,
                        preferred_element_type=jnp.float32)   # (Bt, S, S)

    # ---- numerically stable softmax, all f32 --------------------------------
    m = jnp.max(scores, axis=-1, keepdims=True)
    e = jnp.exp(scores - m)
    denom = jnp.sum(e, axis=-1, keepdims=True)
    # EUP approximate reciprocal + one Newton-Raphson refinement (full f32
    # accuracy while keeping the divide off the VALU).
    r = pl.reciprocal(denom, approx=True)
    r = r * (2.0 - denom * r)
    p = e * r

    # ---- attn_vec = einsum('ijk,ikl->ijl', p, v) ----------------------------
    out = jnp.einsum('bqk,bkd->bqd', p, v,
                     preferred_element_type=jnp.float32)      # (Bt, S, Dp)

    o_ref[...] = out.astype(o_ref.dtype)


def _pick_block_b(B, S, target_rows=256):
    """Largest divisor of B with Bt*S <= target_rows, preferring >= 2 grid
    steps (when B >= 2) so both v7x TensorCores get work."""
    divisors = [d for d in range(1, B + 1) if B % d == 0]
    candidates = [d for d in divisors if d * S <= target_rows] or [1]
    bt = max(candidates)
    if B >= 2:
        two_step = [d for d in candidates if B // d >= 2]
        if two_step:
            bt = max(two_step)
    return bt


def self_attention(x, wq, bq, wk, bk, wv, bv, *, block_b=None):
    """x: (B, S, Din); w*: (Din, Dout) (pre-transposed nn.Linear weights);
    b*: (Dout,) or (1, Dout).  Returns (B, S, Dout)."""
    B, S, Din = x.shape
    Dout = wq.shape[1]

    # Pad Dout up to a lane-dense multiple of 128 and fuse the three
    # projections into one weight / one bias.  Padded columns are zero, so
    # scores and outputs are unchanged; the pad is sliced off at the end.
    Dp = max(128, ((Dout + 127) // 128) * 128)

    def pad_w(w):
        return jnp.pad(w, ((0, 0), (0, Dp - Dout)))

    def pad_b(b):
        return jnp.pad(b.reshape(1, Dout), ((0, 0), (0, Dp - Dout)))

    wqkv = jnp.concatenate([pad_w(wq), pad_w(wk), pad_w(wv)], axis=1)  # (Din, 3*Dp)
    bqkv = jnp.concatenate([pad_b(bq), pad_b(bk), pad_b(bv)], axis=1)  # (1, 3*Dp)

    if block_b is None:
        block_b = _pick_block_b(B, S)
    assert B % block_b == 0, "block_b must divide the batch size"
    grid = (B // block_b,)

    kernel = functools.partial(_self_attention_kernel, dp=Dp)

    # Note: the weight/bias specs have a constant index_map; double-buffering
    # them wastes a little VMEM but is negligible at these sizes.
    out_padded = pl.pallas_call(
        kernel,
        out_shape=jax.ShapeDtypeStruct((B, S, Dp), x.dtype),
        grid_spec=pltpu.PrefetchScalarGridSpec(
            num_scalar_prefetch=0,
            grid=grid,
            in_specs=[
                pl.BlockSpec((block_b, S, Din), lambda b: (b, 0, 0)),  # x tile
                pl.BlockSpec((Din, 3 * Dp), lambda b: (0, 0)),          # fused W
                pl.BlockSpec((1, 3 * Dp), lambda b: (0, 0)),            # fused bias
            ],
            out_specs=pl.BlockSpec((block_b, S, Dp), lambda b: (b, 0, 0)),
        ),
        compiler_params=pltpu.CompilerParams(
            dimension_semantics=("parallel",)),
    )(x, wqkv, bqkv)

    return out_padded[..., :Dout]


def _reference(x, wq, bq, wk, bk, wv, bv):
    q = jnp.einsum('bsd,de->bse', x, wq) + bq.reshape(1, 1, -1)
    k = jnp.einsum('bsd,de->bse', x, wk) + bk.reshape(1, 1, -1)
    v = jnp.einsum('bsd,de->bse', x, wv) + bv.reshape(1, 1, -1)
    attn = jnp.einsum('ijk,ilk->ijl', q, k)
    attn_prob = jax.nn.softmax(attn, axis=-1)
    return jnp.einsum('ijk,ikl->ijl', attn_prob, v)


if __name__ == "__main__":
    B, S, in_dim, out_dim = 2, 8, 32, 32

    key = jax.random.PRNGKey(0)
    kx, kwq, kbq, kwk, kbk, kwv, kbv = jax.random.split(key, 7)

    x = jax.random.normal(kx, (B, S, in_dim), dtype=jnp.float32)

    # Deterministic parameter init (shapes follow nn.Linear(in_dim, out_dim));
    # stored pre-transposed as (in_dim, out_dim) for the kernel.
    scale = 1.0 / jnp.sqrt(jnp.float32(in_dim))
    wq = jax.random.uniform(kwq, (in_dim, out_dim), jnp.float32, -scale, scale)
    bq = jax.random.uniform(kbq, (1, out_dim), jnp.float32, -scale, scale)
    wk = jax.random.uniform(kwk, (in_dim, out_dim), jnp.float32, -scale, scale)
    bk = jax.random.uniform(kbk, (1, out_dim), jnp.float32, -scale, scale)
    wv = jax.random.uniform(kwv, (in_dim, out_dim), jnp.float32, -scale, scale)
    bv = jax.random.uniform(kbv, (1, out_dim), jnp.float32, -scale, scale)

    out = self_attention(x, wq, bq, wk, bk, wv, bv)
    out = jax.block_until_ready(out)

    ref = _reference(x, wq, bq, wk, bk, wv, bv)
    assert out.shape == (B, S, out_dim)
    assert jnp.allclose(out, ref, atol=1e-4, rtol=1e-4), "mismatch vs JAX reference"

    print("KERNEL_OK")
</pallas_src>

<mosaic_0001>
module attributes {stable_mosaic.version = 11 : i64} {
  func.func @_self_attention_kernel(%arg0: i32, %arg1: memref<1x8x32xf32, #tpu.memory_space<vmem>>, %arg2: memref<32x384xf32, #tpu.memory_space<vmem>>, %arg3: memref<1x384xf32, #tpu.memory_space<vmem>>, %arg4: memref<1x8x128xf32, #tpu.memory_space<vmem>>) attributes {dimension_semantics = [#tpu.dimension_semantics<parallel>], iteration_bounds = array<i64: 2>, scalar_prefetch = 0 : i64, scratch_operands = 0 : i64, tpu.core_type = #tpu.core_type<tc>, window_params = [{transform_indices = @transform_0, window_bounds = array<i64: 1, 8, 32>}, {pipeline_mode = #tpu.pipeline_mode<synchronous>, transform_indices = @transform_1, window_bounds = array<i64: 32, 384>}, {pipeline_mode = #tpu.pipeline_mode<synchronous>, transform_indices = @transform_2, window_bounds = array<i64: 1, 384>}, {transform_indices = @transform_3, window_bounds = array<i64: 1, 8, 128>}]} {
    %c0 = arith.constant 0 : index
    %c0_0 = arith.constant 0 : index
    %c0_1 = arith.constant 0 : index
    %0 = vector.load %arg1[%c0, %c0_0, %c0_1] : memref<1x8x32xf32, #tpu.memory_space<vmem>>, vector<1x8x32xf32>
    %1 = vector.shape_cast %0 : vector<1x8x32xf32> to vector<8x32xf32>
    %c0_2 = arith.constant 0 : index
    %c0_3 = arith.constant 0 : index
    %2 = vector.load %arg2[%c0_2, %c0_3] : memref<32x384xf32, #tpu.memory_space<vmem>>, vector<32x384xf32>
    %cst = arith.constant dense<0.000000e+00> : vector<8x384xf32>
    %3 = tpu.matmul %1, %2, %cst {dimension_numbers = #tpu.dot_dimension_numbers<[1], [0], [0], [1], [0, 0, 1, 1], [], []>} : vector<8x32xf32>, vector<32x384xf32>, vector<8x384xf32> -> vector<8x384xf32>
    %c0_4 = arith.constant 0 : index
    %c0_5 = arith.constant 0 : index
    %4 = vector.load %arg3[%c0_4, %c0_5] : memref<1x384xf32, #tpu.memory_space<vmem>>, vector<1x384xf32>
    %5 = vector.broadcast %4 : vector<1x384xf32> to vector<8x384xf32>
    %6 = arith.addf %3, %5 : vector<8x384xf32>
    %7 = vector.shape_cast %6 : vector<8x384xf32> to vector<1x8x384xf32>
    %8 = vector.extract_strided_slice %7 {offsets = [0, 0, 0], sizes = [1, 8, 128], strides = [1, 1, 1]} : vector<1x8x384xf32> to vector<1x8x128xf32>
    %9 = vector.extract_strided_slice %7 {offsets = [0, 0, 128], sizes = [1, 8, 128], strides = [1, 1, 1]} : vector<1x8x384xf32> to vector<1x8x128xf32>
    %10 = vector.extract_strided_slice %7 {offsets = [0, 0, 256], sizes = [1, 8, 128], strides = [1, 1, 1]} : vector<1x8x384xf32> to vector<1x8x128xf32>
    "tpu.trace_start"() <{level = 10 : i32, message = "bqd,bkd->bqk"}> : () -> ()
    %cst_6 = arith.constant dense<0.000000e+00> : vector<1x8x8xf32>
    %11 = tpu.matmul %8, %9, %cst_6 {dimension_numbers = #tpu.dot_dimension_numbers<[2], [2], [1], [1], [0, 0, 0, 1, 1, 1], [0], [0]>} : vector<1x8x128xf32>, vector<1x8x128xf32>, vector<1x8x8xf32> -> vector<1x8x8xf32>
    "tpu.trace_stop"() : () -> ()
    %cst_7 = arith.constant dense<0xFF800000> : vector<1x8xf32>
    %12 = vector.multi_reduction <maximumf>, %11, %cst_7 [2] : vector<1x8x8xf32> to vector<1x8xf32>
    %13 = vector.shape_cast %12 : vector<1x8xf32> to vector<1x8x1xf32>
    %14 = vector.broadcast %13 : vector<1x8x1xf32> to vector<1x8x8xf32>
    %15 = arith.subf %11, %14 : vector<1x8x8xf32>
    %16 = math.exp %15 : vector<1x8x8xf32>
    %cst_8 = arith.constant dense<0.000000e+00> : vector<1x8xf32>
    %17 = vector.multi_reduction <add>, %16, %cst_8 [2] : vector<1x8x8xf32> to vector<1x8xf32>
    %18 = vector.shape_cast %17 : vector<1x8xf32> to vector<1x8x1xf32>
    %19 = tpu.reciprocal %18 {approx = true} : vector<1x8x1xf32> -> vector<1x8x1xf32>
    %20 = arith.mulf %18, %19 : vector<1x8x1xf32>
    %cst_9 = arith.constant 2.000000e+00 : f32
    %21 = vector.broadcast %cst_9 : f32 to vector<1x8x1xf32>
    %22 = arith.subf %21, %20 : vector<1x8x1xf32>
    %23 = arith.mulf %19, %22 : vector<1x8x1xf32>
    %24 = vector.broadcast %23 : vector<1x8x1xf32> to vector<1x8x8xf32>
    %25 = arith.mulf %16, %24 : vector<1x8x8xf32>
    "tpu.trace_start"() <{level = 10 : i32, message = "bqk,bkd->bqd"}> : () -> ()
    %cst_10 = arith.constant dense<0.000000e+00> : vector<1x8x128xf32>
    %26 = tpu.matmul %25, %10, %cst_10 {dimension_numbers = #tpu.dot_dimension_numbers<[2], [1], [1], [2], [0, 0, 0, 1, 1, 2], [0], [0]>} : vector<1x8x8xf32>, vector<1x8x128xf32>, vector<1x8x128xf32> -> vector<1x8x128xf32>
    "tpu.trace_stop"() : () -> ()
    %c0_11 = arith.constant 0 : index
    %c0_12 = arith.constant 0 : index
    %c0_13 = arith.constant 0 : index
    %27 = vector.load %arg4[%c0_11, %c0_12, %c0_13] : memref<1x8x128xf32, #tpu.memory_space<vmem>>, vector<1x8x128xf32>
    tpu.vector_store %arg4[%c0_11, %c0_12, %c0_13], %26 {strides = array<i32>} : memref<1x8x128xf32, #tpu.memory_space<vmem>>, vector<1x8x128xf32>,
    return
  }
  func.func @transform_0(%arg0: i32) -> (i32, i32, i32) {
    %c0_i32 = arith.constant 0 : i32
    %c0_i32_0 = arith.constant 0 : i32
    %c0_i32_1 = arith.constant 0 : i32
    return %arg0, %c0_i32, %c0_i32_0 : i32, i32, i32
  }
  func.func @transform_1(%arg0: i32) -> (i32, i32) {
    %c0_i32 = arith.constant 0 : i32
    %c0_i32_0 = arith.constant 0 : i32
    %c0_i32_1 = arith.constant 0 : i32
    return %c0_i32, %c0_i32_0 : i32, i32
  }
  func.func @transform_2(%arg0: i32) -> (i32, i32) {
    %c0_i32 = arith.constant 0 : i32
    %c0_i32_0 = arith.constant 0 : i32
    %c0_i32_1 = arith.constant 0 : i32
    return %c0_i32, %c0_i32_0 : i32, i32
  }
  func.func @transform_3(%arg0: i32) -> (i32, i32, i32) {
    %c0_i32 = arith.constant 0 : i32
    %c0_i32_0 = arith.constant 0 : i32
    %c0_i32_1 = arith.constant 0 : i32
    return %arg0, %c0_i32, %c0_i32_0 : i32, i32, i32
  }
}

</mosaic_0001>

<bundles_post_ra>
// kernel: tpu_custom_call.1
= control target key start
LH: loop header
LB: loop body
LE: loop exit
PB: predicated region body
PF: predicated region fallthrough
CT: control target
= control target key end

     0   :  { %8 = vsyncpa [#allocation3], 0  ;;  %s1073_s0 = inlined_call_operand.hbm [shape: f32[2,8,32], index: 0, kind: input, shape index: {}]   ;;  %s1074_s1 = inlined_call_operand.hbm [shape: f32[32,384], index: 1, kind: input, shape index: {}]   ;;  %s1075_s2 = inlined_call_operand.vmem [shape: f32[1,384], index: 2, kind: input, shape index: {}]   ;;  %s1076_s3 = inlined_call_operand.hbm [shape: f32[2,8,128], index: 3, kind: output, shape index: {}]  }
   0x1   :  { %10 = vsyncpa [#allocation3 + $0x1], 0 }
   0x2   :  { %11 = vsyncpa [#allocation6], 0 }
   0x3   :  { %12 = vsyncpa [#allocation4], 0 }
   0x4   :  { %14 = vsyncpa [#allocation4 + $0x1], 0  ;;  %s892_s12 = smov 0   ;;  %s894_s13 = smov 0  }
   0x5   :  { %s896_s14 = smov 0   ;;  %s898_s15 = smov 0  }
   0x6 LB: > { %s913_s16 = sadd.s32 4294967295, %s863_s15   ;;  %s629_s17 = sadd.s32 4294967294, %s863_s15   ;;  %s863_s15 = sphi %s898_s15, %s1098_s15   ;;  %s859_s14 = sphi %s896_s14, %s1097_s14   ;;  %s855_s13 = sphi %s894_s13, %s1096_s13   ;;  %s851_s12 = sphi %s892_s12, %s1095_s12  }
   0x7   : > { %p40_p0 = scmp.ne.s32.totalorder %s855_s13, %s851_s12  ;;  %p1077_p1 = scmp.eq.s32.totalorder %s913_s16, 0 }
   0x8   : > { %p112_p3 = scmp.eq.s32.totalorder %s629_s17, 1  ;;  %p630_p5 = scmp.ge.s32.totalorder %s863_s15, 1 }
   0x9   : > { %p922_p4 = por %p1077_p1, %p40_p0  ;;  %p119_p7 = scmp.lt.s32.totalorder %s863_s15, 3 }
   0xa   : > { %p927_p6 = por %p112_p3, %p40_p0  ;;  %s865_s21 = smov [#allocation5]  }
   0xb   : > { %s1081_s18 = scalar_select %p922_p4, 1, 0 }
   0xc   : > { %s1082_s19 = scalar_select %p927_p6, 1, 0 }
   0xd   : > { %p932_p8 = pnand %p630_p5, %p119_p7  ;;  %s131_s22 = sshll.u32 %s865_s21, 4  ;;  %s132_s22 = int_to_ptr.vmem [resolvable:$true] %s131_s22 }
   0xe   : > { %s946_s24 = sadd.s32 1, %s863_s15   ;;  %s27_s25 = sadd.s32 1, %s859_s14 }
   0xf   : > { %s1083_s20 = scalar_select %p932_p8, 1, 0 }
  0x10   : > { %p684_p9 = pneg %p932_p8  ;;  %s24_s26 = ssub.s32 %s863_s15, %s946_s24 }
  0x11   : > { %s752_s27 = scalar_lea.vmem %s132_s22, 1536  ;;  %p760_p5 = scmp.lt.s32.totalorder %s132_s22, %s132_s22 }
  0x12   : > { %p941_p11 = pnand %p684_p9, %p1077_p1  ;;  %p753_p13 = scmp.ne.s32.totalorder %s132_s22, %s752_s27 }
  0x13   : > { %p761_p7 = scmp.lt.s32.totalorder %s752_s27, %s752_s27 }
  0x14   : > { %p743_p12 = pneg %p941_p11 }
  0x15   : > { %p762_p10 = por %p761_p7, %p760_p5 }
  0x16   : > { %p755_p0 = pnand %p753_p13, %p743_p12 }
  0x18   : > { %p756_p3 = pneg %p755_p0 }
  0x1a   : > { %p763_p2 = pnand %p762_p10, %p756_p3 }
  0x1c   : > { %766 = shalt.err (!%p763_p2)
}
  0x1d   : > { %s866_s28 = smov 384   ;;  %s867_s29 = smov 24  }
  0x1e   : > { %687 = dma.hbm_to_vmem [thread:$0]  (!%p941_p11), %s1074_s1, 1536, %s132_s22, [#allocation6], %s866_s28, %s866_s28, %s867_s29  }
  0x1f   : > { %p25_p9 = scmp.eq.s32.totalorder %s24_s26, 0  ;;  %p34_p12 = scmp.ne.s32.totalorder %s859_s14, %s855_s13 }
  0x20   : > { %p35_p10 = scmp.eq.s32.totalorder %s863_s15, 0  ;;  %p697_p2 = scmp.lt.s32.totalorder %s863_s15, 2 }
  0x21   : > { %s963_s5 = scalar_select %p25_p9, %s859_s14, %s27_s25  }
  0x22   : > { %p36_p13 = por %p35_p10, %p34_p12  ;;  %p1085_p0 = scmp.eq.s32.totalorder %s913_s16, 1 }
  0x23   : > { %s148_s7 = sand.u32 1, %s859_s14   ;;  %s634_s8 = sshll.u32 %s863_s15, 7 }
  0x24   : > { %p967_p3 = por %p1085_p0, %p34_p12  ;;  %s633_s9 = sshll.u32 %s148_s7, 3 }
  0x25   : > { %s976_s17 = scalar_lea.hbm %s1073_s0, %s634_s8  ;;  %s152_s21 = scalar_lea.vmem [#allocation2], %s633_s9 }
  0x26   : > { %s1086_s6 = scalar_select %p967_p3, 1, 0 }
  0x27   : > { %s159_s22 = sshll.u32 %s152_s21, 4  ;;  %p978_p11 = pnand %p697_p2, %p36_p13  ;;  %s160_s22 = int_to_ptr.vmem [resolvable:$true] %s159_s22 }
  0x28   : > { %s149_s25 = scalar_lea.sflag [#allocation3], %s148_s7  ;;  %s767_s26 = scalar_lea.hbm %s976_s17, 128 }
  0x29   : > { %p768_p5 = scmp.ne.s32.totalorder %s976_s17, %s767_s26  ;;  %p769_p7 = pneg %p978_p11 }
  0x2a   : > { %s772_s29 = scalar_lea.hbm %s1073_s0, 256  ;;  %p773_p10 = scmp.lt.s32.totalorder %s976_s17, %s1073_s0 }
  0x2b   : > { %p770_p9 = pnand %p769_p7, %p768_p5  ;;  %p774_p2 = scmp.lt.s32.totalorder %s772_s29, %s767_s26 }
  0x2d   : > { %p771_p12 = pneg %p770_p9  ;;  %p775_p13 = por %p774_p2, %p773_p10 }
  0x2f   : > { %p776_p0 = pnand %p775_p13, %p771_p12 }
  0x31   : > { %779 = shalt.err (!%p776_p0)
}
  0x32   : > { %s780_s8 = scalar_lea.vmem %s160_s22, 128  ;;  %s868_s7 = smov [#allocation2]  }
  0x33   : > { %p781_p1 = scmp.ne.s32.totalorder %s160_s22, %s780_s8  ;;  %s785_s9 = sshll.u32 %s868_s7, 4  ;;  %s786_s9 = int_to_ptr.vmem [resolvable:$false] %s785_s9 }
  0x34   : > { %s787_s10 = scalar_lea.vmem %s786_s9, 256  ;;  %p788_p5 = scmp.lt.s32.totalorder %s160_s22, %s786_s9 }
  0x35   : > { %p783_p6 = pnand %p781_p1, %p769_p7  ;;  %p789_p9 = scmp.lt.s32.totalorder %s787_s10, %s780_s8 }
  0x37   : > { %p784_p3 = pneg %p783_p6  ;;  %p790_p4 = por %p789_p9, %p788_p5 }
  0x39   : > { %p791_p8 = pnand %p790_p4, %p784_p3 }
  0x3b   : > { %794 = shalt.err (!%p791_p8)
}
  0x3c   : > { %691 = dma.hbm_to_vmem [thread:$0]  (!%p978_p11), %s976_s17, 128, %s160_s22, %s149_s25  }
  0x3d   : > { %p1088_p12 = scmp.ne.s32.totalorder %s1083_s20, 0 }
  0x3e   : > { %s999_s11 = sand.u32 (!%p1088_p12), 1, %s855_s13   ;;  %p1089_p1 = scmp.ne.s32.totalorder (!%p1088_p12), %s1081_s18, 0 }
  0x3f   : > { %168 = sbr.rel (%p1088_p12) target bundleno = 1000 (0x3e8), region = 32  ;;  %s636_s21 = sshll.u32 (!%p1088_p12), %s999_s11, 3 }
  0x40   : > { %s171_s26 = scalar_lea.sflag (!%p1088_p12), [#allocation3], %s999_s11  ;;  %s174_s27 = scalar_lea.vmem (!%p1088_p12), [#allocation2], %s636_s21 }
  0x44   : > { %838 = dma.done.wait (%p1089_p1), %s171_s26, 128  }
  0x45   : > { %840 = vsyncadd (%p1089_p1), %s171_s26, 4294967168  ;;  %p1090_p4 = scmp.eq.s32.totalorder %s913_s16, 0 }
  0x47   : > { %842 = dma.done.wait (%p1090_p4), [#allocation6], 1536   ;;  %p1091_p6 = pmov %p1090_p4 }
  0x48   : > { %v869_v0 = vmov 0.0   ;;  %v212_v1 = vld [vmem:[#allocation5 + $0x50] sm:$0xff]  ;;  %v211_v2 = vld [vmem:[#allocation5 + $0x48] sm:$0xff]  ;;  %v209_v3 = vld [vmem:[#allocation5 + $0x38] sm:$0xff]  ;;  %vm231_vm0 = vcmask 261120   ;;  %vm870_vm1 = vmmov 0   ;;  %v216_v10 = vlaneseq }
  0x49   : > { %844 = vsyncadd (%p1091_p6), [#allocation6], 4294965760  ;;  %299 = vmatprep.mubr.f32.mxu0 %v869_v0  ;;  %655 = vmatprep.subr.mxu1 %v869_v0  ;;  %v208_v4 = vld [vmem:[#allocation5 + $0x30] sm:$0xff]  ;;  %v206_v5 = vld [vmem:[#allocation5 + $0x20] sm:$0xff]  ;;  %vm446_vm2 = vcmask 64512   ;;  %s200_s17 = scalar_lea.vmem [#allocation7], %s636_s21 }
  0x4a   : > { %259 = vmatprep.subr.mxu0 %v212_v1  ;;  %v205_v6 = vld [vmem:[#allocation5 + $0x18] sm:$0xff]  ;;  %v203_v7 = vld [vmem:[#allocation5 + $0x8] sm:$0xff]  ;;  %v202_v8 = vld [vmem:[#allocation5] sm:$0xff]  ;;  %663 = vmatprep.mubr.msk.f32.mxu1 %vm870_vm1, %v869_v0  ;;  %v217_v11 = vshrl.u32 %v216_v10, 7  ;;  %s549_s22 = sshll.u32 %s200_s17, 4  ;;  %s643_s23 = sshll.u32 %s913_s16, 7  ;;  %s1027_s22 = int_to_ptr.vmem [resolvable:$true] %s549_s22 }
  0x4b   : > { %260 = vmatpush1.msra.mxu0 %v211_v2  ;;  %v201_v9 = vld [vmem:[%s174_s27] sm:$0xff]  ;;  %v210_v22 = vld [vmem:[#allocation5 + $0x40] sm:$0xff]  ;;  %v207_v23 = vld [vmem:[#allocation5 + $0x28] sm:$0xff]  ;;  %s1032_s29 = scalar_lea.hbm %s1076_s3, %s643_s23  ;;  %s536_s30 = scalar_lea.sflag [#allocation4], %s999_s11 }
  0x4c   : > { %261 = vmatprep.subr.mxu0 %v209_v3  ;;  %v222_v12 = vsub.s32 1, %v217_v11  ;;  %v214_v13 = vld [vmem:[%s1075_s2] sm:$0x7]  ;;  %v218_v14 = vsub.s32 0, %v217_v11  ;;  %v213_v21 = vld [vmem:[#allocation5 + $0x58] sm:$0xff]  ;;  %v226_v33 = vsub.s32 2, %v217_v11 }
  0x4d   : > { %262 = vmatpush1.msra.mxu0 %v208_v4  ;;  %656 = vmatpush3.msra.mxu1 %v213_v21  ;;  %v204_v24 = vld [vmem:[#allocation5 + $0x10] sm:$0xff]  ;;  %s795_s4 = scalar_lea.vmem %s1027_s22, 128  ;;  %p1092_p3 = scmp.ne.s32.totalorder %s1086_s6, 0 }
  0x4e   : > { %263 = vmatprep.subr.mxu0 %v206_v5  ;;  %v223_v15 = vrot.slane %v214_v13, %v222_v12  ;;  %v219_v17 = vrot.slane %v214_v13, %v218_v14  ;;  %657 = vmatprep.subr.mxu1 %v869_v0  ;;  %v227_v35 = vrot.slane %v214_v13, %v226_v33  ;;  %p796_p8 = scmp.ne.s32.totalorder %s1027_s22, %s795_s4  ;;  %s871_s16 = smov [#allocation7]  }
  0x4f   : > { %264 = vmatpush1.msra.mxu0 %v205_v6  ;;  %658 = vmatpush3.msra.mxu1 %v210_v22  ;;  %s799_s8 = sshll.u32 %s871_s16, 4  ;;  %s800_s8 = int_to_ptr.vmem [resolvable:$false] %s799_s8 }
  0x50   : > { %265 = vmatprep.subr.mxu0 %v203_v7  ;;  %659 = vmatprep.subr.mxu1 %v869_v0  ;;  %p797_p11 = pnand %p796_p8, %p1092_p3  ;;  %s801_s7 = scalar_lea.vmem %s800_s8, 256 }
  0x51   : > { %266 = vmatpush1.msra.mxu0 %v202_v8  ;;  %660 = vmatpush3.msra.mxu1 %v207_v23  ;;  %p802_p10 = scmp.lt.s32.totalorder %s1027_s22, %s800_s8  ;;  %p803_p2 = scmp.lt.s32.totalorder %s801_s7, %s795_s4 }
  0x52   : > { %639 = vmatmul.mubr.msk.f32.vlgmr.msra.gmra.mxu0 %vm231_vm0, %v201_v9  ;;  %666 = vmatprep.subr.mxu0 %v869_v0  ;;  %p798_p7 = pneg %p797_p11 }
  0x53   : > { %668 = vmatprep.mubr.msk.f32.mxu0 %vm870_vm1, %v869_v0  ;;  %661 = vmatprep.subr.mxu1 %v869_v0  ;;  %p804_p13 = por %p803_p2, %p802_p10 }
  0x54   : > { %662 = vmatpush3.msra.mxu1 %v204_v24 }
  0x55   : > { %664 = vmatmul.mubr.msk.f32.vlgmr.msra.gmra.mxu1 %vm231_vm0, %v201_v9  ;;  %671 = vmatprep.subr.mxu1 %v869_v0  ;;  %p805_p0 = pnand %p804_p13, %p798_p7 }
  0x56   : > { %673 = vmatprep.mubr.msk.f32.mxu1 %vm870_vm1, %v869_v0 }
 0x112   : > { %v301_v16 = vpop.f32.mrf.mxu0 }
 0x113   : > { %v302_v20 = vadd.f32 %v301_v16, %v219_v17 }
 0x114   : > { %v303_v18 = vpop.f32.mrf.mxu0 }
 0x115   : > { %v304_v19 = vadd.f32 %v303_v18, %v223_v15  ;;  %v372_v34 = vpop.f32.mrf.mxu1 }
 0x116   : > { %v373_v37 = vadd.f32 %v372_v34, %v227_v35 }
 0x117   : > { %667 = vmatpush3.xpose.msra.mxu0 %v304_v19  ;;  %v665_v36 = vpop.f32.mrf.mxu1 }
 0x118   : > { %672 = vmatpush3.msra.mxu1 %v373_v37 }
 0x11a   : > { %669 = vmatmul.mubr.f32.vlgmr.msra.gmra.mxu0 %v302_v20 }
 0x1da   : > { %v442_v25 = vpop.f32.mrf.mxu0 }
 0x1db   : > { %v447_v26 = vsel %vm446_vm2, %v442_v25, -inf }
 0x1dc   : > { %448 = vmax.xlane.f32.xlu0 %v447_v26  ;;  %v670_v27 = vpop.f32.mrf.mxu0 }
 0x265   : > { %v449_v28 = vpop.xlane.xlu0 %448 }
 0x266   : > { %v450_v29 = vsub.f32 %v442_v25, %v449_v28 }
 0x268   : > { %v451_v30 = vmul.f32 1.442695, %v450_v29 }
 0x26a   : > { %737 = vpow2.f32 %v451_v30 }
 0x277   : > { %v738_v31 = vpop.eup %737 }
 0x278   : > { %v453_v32 = vsel %vm446_vm2, %v738_v31, 0.0 }
 0x279   : > { %454 = vadd.xlane.f32.xlu0 %v453_v32 }
 0x302   : > { %v455_v38 = vpop.xlane.xlu0 %454 }
 0x303   : > { %739 = vrcp.f32 %v455_v38 }
 0x310   : > { %v740_v39 = vpop.eup %739 }
 0x311   : > { %v457_v40 = vmul.f32 %v740_v39, %v455_v38 }
 0x313   : > { %v458_v41 = vsub.f32 2.0, %v457_v40 }
 0x315   : > { %v459_v42 = vmul.f32 %v740_v39, %v458_v41 }
 0x317   : > { %v460_v43 = vmul.f32 %v738_v31, %v459_v42 }
 0x319   : > { %674 = vmatmul.mubr.msk.f32.vlgmr.msra.gmra.mxu1 %vm446_vm2, %v460_v43 }
 0x3d9   : > { %v530_v44 = vpop.f32.mrf.mxu1 }
 0x3da   : > { %534 = vst [vmem:[%s200_s17] sm:$0xff] %v530_v44 }
 0x3db   : > { %v675_v45 = vpop.f32.mrf.mxu1 }
 0x3dc   : > { %808 = shalt.err (!%p805_p0)
}
 0x3dd   : > { %s809_s9 = scalar_lea.hbm %s1032_s29, 128  ;;  %s813_s21 = scalar_lea.hbm %s1076_s3, 256 }
 0x3de   : > { %p810_p5 = scmp.ne.s32.totalorder %s1032_s29, %s809_s9  ;;  %p814_p1 = scmp.lt.s32.totalorder %s1032_s29, %s1076_s3 }
 0x3df   : > { %p815_p4 = scmp.lt.s32.totalorder %s813_s21, %s809_s9 }
 0x3e0   : > { %p811_p9 = pnand %p810_p5, %p1092_p3 }
 0x3e1   : > { %p816_p6 = por %p815_p4, %p814_p1 }
 0x3e2   : > { %p812_p12 = pneg %p811_p9 }
 0x3e4   : > { %p817_p8 = pnand %p816_p6, %p812_p12 }
 0x3e6   : > { %820 = shalt.err (!%p817_p8)
}
 0x3e7   : > { %682 = dma.vmem_to_hbm [thread:$0]  (%p1092_p3), %s1027_s22, 128, %s1032_s29, %s536_s30  }
 0x3e8 PF: > { %s561_s18 = sand.u32 1, %s851_s12   ;;  %p1093_p11 = scmp.ne.s32.totalorder %s1082_s19, 0 }
 0x3e9   : > { %p1094_p7 = scmp.ge.s32.totalorder %s863_s15, 2  ;;  %s562_s20 = scalar_lea.sflag [#allocation4], %s561_s18 }
 0x3eb   : > { %p693_p10 = pnand %p1094_p7, %p1093_p11 }
 0x3ed   : > { %p694_p2 = pneg %p693_p10 }
 0x3ef   : > { %846 = dma.done.wait (%p694_p2), %s562_s20, 128  }
 0x3f0   : > { %848 = vsyncadd (%p694_p2), %s562_s20, 4294967168  ;;  %p17_p13 = scmp.ge.s32.totalorder %s946_s24, 4   ;;  %s1095_s12 = smov %s855_s13 }
 0x3f1   : > { %s1096_s13 = smov %s859_s14  ;;  %s1097_s14 = smov %s963_s5 }
 0x3f2   : > { %s1098_s15 = smov %s946_s24  ;;  %19 = sbr.rel (!%p17_p13) target bundleno = 6 (0x6), region = 81 }
 0x3f7   :  { %567 = vsyncpa [#allocation3], 1 }
 0x3f8   :  { %569 = vsyncpa [#allocation3 + $0x1], 1 }
 0x3f9   :  { %570 = vsyncpa [#allocation6], 1 }
 0x3fa   :  { %571 = vsyncpa [#allocation4], 1 }
 0x3fb   :  { %573 = vsyncpa [#allocation4 + $0x1], 1 }

</bundles_post_ra>
